<compile_context>
chip_gen: v7x
topology: tpu7x:2x2x1
jax: 0.10.0
libtpu: 0.0.40
codegen_flags: <defaults>
</compile_context>

<pallas_src>
import functools

import jax
import jax.numpy as jnp
from jax import lax
from jax.experimental import pallas as pl
from jax.experimental.pallas import tpu as pltpu

# ---- small, forward-consistent hyperparameters ----
BATCH = 8
INPUT_DIM = 32
NUM_EXPERTS = 16
TOP_K = 8
OUT_DIM = 32
LOSS_COEF = 0.01
FUSED_W = 128          # lane width of the fused [D, gate|expert|pad] MXU operand
MAX_TILE_B = 512       # batch rows per grid step (amortize ~0.35 us fixed step cost)


def _round_up(n, m):
    return ((n + m - 1) // m) * m


def gating_kernel(x_ref, wf_ref, bf_ref,
                  gates_ref, out_ref, imp_ref, load_ref,
                  *, num_experts, out_dim, top_k, batch, tile_b):
    E, O = num_experts, out_dim
    x = x_ref[...]                                      # [TB, D] f32
    tb = x.shape[0]

    # One fused lane-dense MXU matmul: cols [0,E)=gate logits, [E,E+O)=x@W_e + b, rest 0.
    fused = jnp.dot(x, wf_ref[...], preferred_element_type=jnp.float32) + bf_ref[...]

    logits = fused[:, :E]                               # [TB, E]
    m = jnp.max(logits, axis=1, keepdims=True)
    e = jnp.exp(logits - m)                             # unnormalized softmax numerator
    z = jnp.sum(e, axis=1, keepdims=True)               # softmax denominator

    # Exact top-k membership via rank counting (VPU compares only; ties broken by lower
    # index, matching lax.top_k / torch.topk).  [TB,E] uses the same vregs as [TB,128].
    lane = lax.broadcasted_iota(jnp.int32, (tb, E), 1)
    rank = jnp.zeros((tb, E), jnp.float32)
    for j in range(E):                                  # static unroll (E is small)
        ej = e[:, j:j + 1]                              # [TB, 1]
        beats = (ej > e) | ((ej == e) & (lane > j))
        rank = rank + beats.astype(jnp.float32)
    mask = rank < float(top_k)                          # exactly top_k True per row

    sel = jnp.where(mask, e, 0.0)
    s = jnp.sum(sel, axis=1, keepdims=True)             # sum of selected numerators
    # gates = (e/z) / (sum_topk(e/z) + 1e-6)  ==  e / (s + 1e-6 * z)   (exact folding)
    d = s + 1e-6 * z
    inv0 = pl.reciprocal(d, approx=True)                # EUP slot (free vs VPU divide)
    inv = inv0 * (2.0 - d * inv0)                       # one Newton step -> ~f32 exact
    gates = sel * inv                                   # [TB, E] scattered top-k gates
    gate_sum = s * inv                                  # == gates.sum(1, keepdims=True)

    if batch % tile_b != 0:
        # Static branch: last tile holds zero-padded rows; zero their gates so the
        # importance / (gates>0) load partials exclude them (padded output rows are
        # sliced off in the wrapper anyway).
        row = pl.program_id(0) * tile_b + lax.broadcasted_iota(jnp.int32, (tb, 1), 0)
        gates = jnp.where(row < batch, gates, 0.0)

    # Direct outputs (no zero-padded 128-lane slab, no wrapper re-slicing).
    gates_ref[...] = gates
    # Shared-params experts: weighted expert sum == (x @ W_e + b) * gates.sum(1).
    out_ref[...] = fused[:, E:E + O] * gate_sum

    # Per-tile load-balancing statistics; the cv^2 loss is finalized in the wrapper so
    # the batch axis needs no cross-tile state and can run "parallel" across cores.
    imp_ref[0] = jnp.sum(gates, axis=0, keepdims=True)                               # importance
    load_ref[0] = jnp.sum((gates > 0.0).astype(jnp.float32), axis=0, keepdims=True)  # load


@functools.partial(jax.jit, static_argnames=("tile_b",))
def gating_forward(x, w_gate, w_expert, b_expert, tile_b=None):
    B, D = x.shape
    E = w_gate.shape[1]
    O = w_expert.shape[1]
    W = FUSED_W
    assert E + O <= W, "fused lane width too small"

    if tile_b is None:
        tile_b = min(MAX_TILE_B, _round_up(B, 8))
    tile_b = max(8, _round_up(int(tile_b), 8))          # sublane-aligned tile
    num_tiles = (B + tile_b - 1) // tile_b              # ceil-div grid
    b_pad = num_tiles * tile_b
    if b_pad != B:
        x = jnp.pad(x, ((0, b_pad - B), (0, 0)))        # zero-padded last tile

    # Pack gate + shared-expert weights/bias into one lane-dense [D, 128] MXU operand.
    w_fused = (jnp.zeros((D, W), jnp.float32)
               .at[:, :E].set(w_gate.astype(jnp.float32))
               .at[:, E:E + O].set(w_expert.astype(jnp.float32)))
    b_fused = (jnp.zeros((1, W), jnp.float32)
               .at[:, E:E + O].set(jnp.reshape(b_expert, (1, O)).astype(jnp.float32)))

    kernel = functools.partial(gating_kernel, num_experts=E, out_dim=O,
                               top_k=TOP_K, batch=B, tile_b=tile_b)

    gates, out, imp_p, load_p = pl.pallas_call(
        kernel,
        out_shape=(
            jax.ShapeDtypeStruct((b_pad, E), jnp.float32),         # gates
            jax.ShapeDtypeStruct((b_pad, O), jnp.float32),         # expert output
            jax.ShapeDtypeStruct((num_tiles, 1, E), jnp.float32),  # per-tile importance
            jax.ShapeDtypeStruct((num_tiles, 1, E), jnp.float32),  # per-tile load
        ),
        grid_spec=pltpu.PrefetchScalarGridSpec(
            num_scalar_prefetch=0,
            grid=(num_tiles,),
            in_specs=[
                pl.BlockSpec((tile_b, D), lambda i: (i, 0)),       # x batch tile
                pl.BlockSpec((D, W), lambda i: (0, 0)),            # fused weights, resident
                pl.BlockSpec((1, W), lambda i: (0, 0)),            # fused bias, resident
            ],
            out_specs=(
                pl.BlockSpec((tile_b, E), lambda i: (i, 0)),
                pl.BlockSpec((tile_b, O), lambda i: (i, 0)),
                pl.BlockSpec((1, 1, E), lambda i: (i, 0, 0)),
                pl.BlockSpec((1, 1, E), lambda i: (i, 0, 0)),
            ),
        ),
        # No cross-tile kernel state -> batch tiles are independent; "parallel" lets the
        # v7x megacore shard them across both TensorCores (no-op on v5e/v6e).
        compiler_params=pltpu.CompilerParams(
            dimension_semantics=("parallel",),
        ),
    )(x, w_fused, b_fused)

    if b_pad != B:
        gates = gates[:B]
        out = out[:B]

    # Aux-loss finalize in the wrapper (E-element math).
    importance = jnp.sum(imp_p, axis=(0, 1))             # [E]
    load = jnp.sum(load_p, axis=(0, 1))                  # [E]
    if E > 1:
        cv_sq = lambda v: jnp.var(v, ddof=1) / (jnp.mean(v) ** 2 + 1e-10)
        loss = LOSS_COEF * (cv_sq(importance) + cv_sq(load))
    else:
        loss = jnp.float32(0.0)                           # module returns 0 for size-1 stats
    return out, loss, gates


def reference_forward(x, w_gate, w_expert, b_expert):
    """Pure-JAX reference of the eval-mode PyTorch forward."""
    logits = x @ w_gate
    probs = jax.nn.softmax(logits, axis=1)
    top_vals, top_idx = jax.lax.top_k(probs, TOP_K)
    top_gates = top_vals / (top_vals.sum(1, keepdims=True) + 1e-6)
    gates = jnp.zeros_like(probs).at[
        jnp.arange(x.shape[0])[:, None], top_idx].set(top_gates)
    importance = gates.sum(0)
    load = (gates > 0).sum(0).astype(jnp.float32)
    cv = lambda v: jnp.var(v, ddof=1) / (jnp.mean(v) ** 2 + 1e-10)
    loss = LOSS_COEF * (cv(importance) + cv(load))
    y = x @ w_expert + jnp.reshape(b_expert, (1, -1))
    return y * gates.sum(1, keepdims=True), loss, gates


if __name__ == "__main__":
    key = jax.random.PRNGKey(0)
    kx, kg, kw, kb, kx2, kx3 = jax.random.split(key, 6)

    # Deterministic params. (The module inits w_gate to zeros which is fully
    # tie-degenerate for top-k; small random values keep the gating path well-defined.)
    w_gate = 0.1 * jax.random.normal(kg, (INPUT_DIM, NUM_EXPERTS), dtype=jnp.float32)
    w_expert = 0.1 * jax.random.normal(kw, (INPUT_DIM, OUT_DIM), dtype=jnp.float32)
    b_expert = 0.1 * jax.random.normal(kb, (1, OUT_DIM), dtype=jnp.float32)

    # --- single-tile path (grid of 1) ---
    x = jax.random.normal(kx, (BATCH, INPUT_DIM), dtype=jnp.float32)
    out, loss, gates = gating_forward(x, w_gate, w_expert, b_expert)
    jax.block_until_ready((out, loss, gates))
    r_out, r_loss, r_gates = reference_forward(x, w_gate, w_expert, b_expert)
    assert jnp.allclose(gates, r_gates, atol=1e-5, rtol=1e-5), "gates mismatch"
    assert jnp.allclose(out, r_out, atol=1e-5, rtol=1e-5), "output mismatch"
    assert jnp.allclose(loss, r_loss, atol=1e-5, rtol=1e-4), "loss mismatch"

    # --- multi-tile path (grid over batch, per-tile stats combined in the wrapper) ---
    x2 = jax.random.normal(kx2, (64, INPUT_DIM), dtype=jnp.float32)
    out2, loss2, gates2 = gating_forward(x2, w_gate, w_expert, b_expert, tile_b=16)
    jax.block_until_ready((out2, loss2, gates2))
    r_out2, r_loss2, r_gates2 = reference_forward(x2, w_gate, w_expert, b_expert)
    assert jnp.allclose(gates2, r_gates2, atol=1e-5, rtol=1e-5), "gates mismatch (tiled)"
    assert jnp.allclose(out2, r_out2, atol=1e-5, rtol=1e-5), "output mismatch (tiled)"
    assert jnp.allclose(loss2, r_loss2, atol=1e-5, rtol=1e-4), "loss mismatch (tiled)"

    # --- ragged batch path (ceil-div grid, zero-padded + masked last tile) ---
    x3 = jax.random.normal(kx3, (50, INPUT_DIM), dtype=jnp.float32)
    out3, loss3, gates3 = gating_forward(x3, w_gate, w_expert, b_expert, tile_b=16)
    jax.block_until_ready((out3, loss3, gates3))
    r_out3, r_loss3, r_gates3 = reference_forward(x3, w_gate, w_expert, b_expert)
    assert jnp.allclose(gates3, r_gates3, atol=1e-5, rtol=1e-5), "gates mismatch (ragged)"
    assert jnp.allclose(out3, r_out3, atol=1e-5, rtol=1e-5), "output mismatch (ragged)"
    assert jnp.allclose(loss3, r_loss3, atol=1e-5, rtol=1e-4), "loss mismatch (ragged)"

    print("KERNEL_OK")
</pallas_src>

<mosaic_0001>
module attributes {stable_mosaic.version = 11 : i64} {
  func.func @gating_kernel(%arg0: i32, %arg1: memref<8x32xf32, #tpu.memory_space<vmem>>, %arg2: memref<32x128xf32, #tpu.memory_space<vmem>>, %arg3: memref<1x128xf32, #tpu.memory_space<vmem>>, %arg4: memref<8x16xf32, #tpu.memory_space<vmem>>, %arg5: memref<8x32xf32, #tpu.memory_space<vmem>>, %arg6: memref<1x1x16xf32, #tpu.memory_space<vmem>>, %arg7: memref<1x1x16xf32, #tpu.memory_space<vmem>>) attributes {dimension_semantics = [#tpu.dimension_semantics<parallel>], iteration_bounds = array<i64: 1>, scalar_prefetch = 0 : i64, scratch_operands = 0 : i64, tpu.core_type = #tpu.core_type<tc>, window_params = [{transform_indices = @transform_0, window_bounds = array<i64: 8, 32>}, {pipeline_mode = #tpu.pipeline_mode<synchronous>, transform_indices = @transform_1, window_bounds = array<i64: 32, 128>}, {pipeline_mode = #tpu.pipeline_mode<synchronous>, transform_indices = @transform_2, window_bounds = array<i64: 1, 128>}, {transform_indices = @transform_3, window_bounds = array<i64: 8, 16>}, {transform_indices = @transform_4, window_bounds = array<i64: 8, 32>}, {transform_indices = @transform_5, window_bounds = array<i64: 1, 1, 16>}, {transform_indices = @transform_6, window_bounds = array<i64: 1, 1, 16>}]} {
    %c0 = arith.constant 0 : index
    %c0_0 = arith.constant 0 : index
    %0 = vector.load %arg1[%c0, %c0_0] : memref<8x32xf32, #tpu.memory_space<vmem>>, vector<8x32xf32>
    %c0_1 = arith.constant 0 : index
    %c0_2 = arith.constant 0 : index
    %1 = vector.load %arg2[%c0_1, %c0_2] : memref<32x128xf32, #tpu.memory_space<vmem>>, vector<32x128xf32>
    %cst = arith.constant dense<0.000000e+00> : vector<8x128xf32>
    %2 = tpu.matmul %0, %1, %cst {dimension_numbers = #tpu.dot_dimension_numbers<[1], [0], [0], [1], [0, 0, 1, 1], [], []>} : vector<8x32xf32>, vector<32x128xf32>, vector<8x128xf32> -> vector<8x128xf32>
    %c0_3 = arith.constant 0 : index
    %c0_4 = arith.constant 0 : index
    %3 = vector.load %arg3[%c0_3, %c0_4] : memref<1x128xf32, #tpu.memory_space<vmem>>, vector<1x128xf32>
    %4 = vector.broadcast %3 : vector<1x128xf32> to vector<8x128xf32>
    %5 = arith.addf %2, %4 : vector<8x128xf32>
    %6 = vector.extract_strided_slice %5 {offsets = [0, 0], sizes = [8, 16], strides = [1, 1]} : vector<8x128xf32> to vector<8x16xf32>
    %cst_5 = arith.constant dense<0xFF800000> : vector<8xf32>
    %7 = vector.multi_reduction <maximumf>, %6, %cst_5 [1] : vector<8x16xf32> to vector<8xf32>
    %8 = vector.shape_cast %7 : vector<8xf32> to vector<8x1xf32>
    %9 = vector.broadcast %8 : vector<8x1xf32> to vector<8x16xf32>
    %10 = arith.subf %6, %9 : vector<8x16xf32>
    %11 = math.exp %10 : vector<8x16xf32>
    %cst_6 = arith.constant dense<0.000000e+00> : vector<8xf32>
    %12 = vector.multi_reduction <add>, %11, %cst_6 [1] : vector<8x16xf32> to vector<8xf32>
    %13 = vector.shape_cast %12 : vector<8xf32> to vector<8x1xf32>
    %14 = tpu.iota {dimensions = array<i32: 1>} : vector<8x16xi32>
    %cst_7 = arith.constant 0.000000e+00 : f32
    %15 = vector.broadcast %cst_7 : f32 to vector<8x16xf32>
    %16 = vector.extract_strided_slice %11 {offsets = [0, 0], sizes = [8, 1], strides = [1, 1]} : vector<8x16xf32> to vector<8x1xf32>
    %17 = vector.broadcast %16 : vector<8x1xf32> to vector<8x16xf32>
    %18 = arith.cmpf ogt, %17, %11 : vector<8x16xf32>
    %19 = vector.broadcast %16 : vector<8x1xf32> to vector<8x16xf32>
    %20 = arith.cmpf oeq, %19, %11 : vector<8x16xf32>
    %c0_i32 = arith.constant 0 : i32
    %21 = vector.broadcast %c0_i32 : i32 to vector<8x16xi32>
    %22 = arith.cmpi sgt, %14, %21 : vector<8x16xi32>
    %23 = arith.andi %20, %22 : vector<8x16xi1>
    %24 = arith.ori %18, %23 : vector<8x16xi1>
    %25 = arith.extui %24 : vector<8x16xi1> to vector<8x16xi32>
    %26 = arith.sitofp %25 : vector<8x16xi32> to vector<8x16xf32>
    %27 = arith.addf %15, %26 : vector<8x16xf32>
    %28 = vector.extract_strided_slice %11 {offsets = [0, 1], sizes = [8, 1], strides = [1, 1]} : vector<8x16xf32> to vector<8x1xf32>
    %29 = vector.broadcast %28 : vector<8x1xf32> to vector<8x16xf32>
    %30 = arith.cmpf ogt, %29, %11 : vector<8x16xf32>
    %31 = vector.broadcast %28 : vector<8x1xf32> to vector<8x16xf32>
    %32 = arith.cmpf oeq, %31, %11 : vector<8x16xf32>
    %c1_i32 = arith.constant 1 : i32
    %33 = vector.broadcast %c1_i32 : i32 to vector<8x16xi32>
    %34 = arith.cmpi sgt, %14, %33 : vector<8x16xi32>
    %35 = arith.andi %32, %34 : vector<8x16xi1>
    %36 = arith.ori %30, %35 : vector<8x16xi1>
    %37 = arith.extui %36 : vector<8x16xi1> to vector<8x16xi32>
    %38 = arith.sitofp %37 : vector<8x16xi32> to vector<8x16xf32>
    %39 = arith.addf %27, %38 : vector<8x16xf32>
    %40 = vector.extract_strided_slice %11 {offsets = [0, 2], sizes = [8, 1], strides = [1, 1]} : vector<8x16xf32> to vector<8x1xf32>
    %41 = vector.broadcast %40 : vector<8x1xf32> to vector<8x16xf32>
    %42 = arith.cmpf ogt, %41, %11 : vector<8x16xf32>
    %43 = vector.broadcast %40 : vector<8x1xf32> to vector<8x16xf32>
    %44 = arith.cmpf oeq, %43, %11 : vector<8x16xf32>
    %c2_i32 = arith.constant 2 : i32
    %45 = vector.broadcast %c2_i32 : i32 to vector<8x16xi32>
    %46 = arith.cmpi sgt, %14, %45 : vector<8x16xi32>
    %47 = arith.andi %44, %46 : vector<8x16xi1>
    %48 = arith.ori %42, %47 : vector<8x16xi1>
    %49 = arith.extui %48 : vector<8x16xi1> to vector<8x16xi32>
    %50 = arith.sitofp %49 : vector<8x16xi32> to vector<8x16xf32>
    %51 = arith.addf %39, %50 : vector<8x16xf32>
    %52 = vector.extract_strided_slice %11 {offsets = [0, 3], sizes = [8, 1], strides = [1, 1]} : vector<8x16xf32> to vector<8x1xf32>
    %53 = vector.broadcast %52 : vector<8x1xf32> to vector<8x16xf32>
    %54 = arith.cmpf ogt, %53, %11 : vector<8x16xf32>
    %55 = vector.broadcast %52 : vector<8x1xf32> to vector<8x16xf32>
    %56 = arith.cmpf oeq, %55, %11 : vector<8x16xf32>
    %c3_i32 = arith.constant 3 : i32
    %57 = vector.broadcast %c3_i32 : i32 to vector<8x16xi32>
    %58 = arith.cmpi sgt, %14, %57 : vector<8x16xi32>
    %59 = arith.andi %56, %58 : vector<8x16xi1>
    %60 = arith.ori %54, %59 : vector<8x16xi1>
    %61 = arith.extui %60 : vector<8x16xi1> to vector<8x16xi32>
    %62 = arith.sitofp %61 : vector<8x16xi32> to vector<8x16xf32>
    %63 = arith.addf %51, %62 : vector<8x16xf32>
    %64 = vector.extract_strided_slice %11 {offsets = [0, 4], sizes = [8, 1], strides = [1, 1]} : vector<8x16xf32> to vector<8x1xf32>
    %65 = vector.broadcast %64 : vector<8x1xf32> to vector<8x16xf32>
    %66 = arith.cmpf ogt, %65, %11 : vector<8x16xf32>
    %67 = vector.broadcast %64 : vector<8x1xf32> to vector<8x16xf32>
    %68 = arith.cmpf oeq, %67, %11 : vector<8x16xf32>
    %c4_i32 = arith.constant 4 : i32
    %69 = vector.broadcast %c4_i32 : i32 to vector<8x16xi32>
    %70 = arith.cmpi sgt, %14, %69 : vector<8x16xi32>
    %71 = arith.andi %68, %70 : vector<8x16xi1>
    %72 = arith.ori %66, %71 : vector<8x16xi1>
    %73 = arith.extui %72 : vector<8x16xi1> to vector<8x16xi32>
    %74 = arith.sitofp %73 : vector<8x16xi32> to vector<8x16xf32>
    %75 = arith.addf %63, %74 : vector<8x16xf32>
    %76 = vector.extract_strided_slice %11 {offsets = [0, 5], sizes = [8, 1], strides = [1, 1]} : vector<8x16xf32> to vector<8x1xf32>
    %77 = vector.broadcast %76 : vector<8x1xf32> to vector<8x16xf32>
    %78 = arith.cmpf ogt, %77, %11 : vector<8x16xf32>
    %79 = vector.broadcast %76 : vector<8x1xf32> to vector<8x16xf32>
    %80 = arith.cmpf oeq, %79, %11 : vector<8x16xf32>
    %c5_i32 = arith.constant 5 : i32
    %81 = vector.broadcast %c5_i32 : i32 to vector<8x16xi32>
    %82 = arith.cmpi sgt, %14, %81 : vector<8x16xi32>
    %83 = arith.andi %80, %82 : vector<8x16xi1>
    %84 = arith.ori %78, %83 : vector<8x16xi1>
    %85 = arith.extui %84 : vector<8x16xi1> to vector<8x16xi32>
    %86 = arith.sitofp %85 : vector<8x16xi32> to vector<8x16xf32>
    %87 = arith.addf %75, %86 : vector<8x16xf32>
    %88 = vector.extract_strided_slice %11 {offsets = [0, 6], sizes = [8, 1], strides = [1, 1]} : vector<8x16xf32> to vector<8x1xf32>
    %89 = vector.broadcast %88 : vector<8x1xf32> to vector<8x16xf32>
    %90 = arith.cmpf ogt, %89, %11 : vector<8x16xf32>
    %91 = vector.broadcast %88 : vector<8x1xf32> to vector<8x16xf32>
    %92 = arith.cmpf oeq, %91, %11 : vector<8x16xf32>
    %c6_i32 = arith.constant 6 : i32
    %93 = vector.broadcast %c6_i32 : i32 to vector<8x16xi32>
    %94 = arith.cmpi sgt, %14, %93 : vector<8x16xi32>
    %95 = arith.andi %92, %94 : vector<8x16xi1>
    %96 = arith.ori %90, %95 : vector<8x16xi1>
    %97 = arith.extui %96 : vector<8x16xi1> to vector<8x16xi32>
    %98 = arith.sitofp %97 : vector<8x16xi32> to vector<8x16xf32>
    %99 = arith.addf %87, %98 : vector<8x16xf32>
    %100 = vector.extract_strided_slice %11 {offsets = [0, 7], sizes = [8, 1], strides = [1, 1]} : vector<8x16xf32> to vector<8x1xf32>
    %101 = vector.broadcast %100 : vector<8x1xf32> to vector<8x16xf32>
    %102 = arith.cmpf ogt, %101, %11 : vector<8x16xf32>
    %103 = vector.broadcast %100 : vector<8x1xf32> to vector<8x16xf32>
    %104 = arith.cmpf oeq, %103, %11 : vector<8x16xf32>
    %c7_i32 = arith.constant 7 : i32
    %105 = vector.broadcast %c7_i32 : i32 to vector<8x16xi32>
    %106 = arith.cmpi sgt, %14, %105 : vector<8x16xi32>
    %107 = arith.andi %104, %106 : vector<8x16xi1>
    %108 = arith.ori %102, %107 : vector<8x16xi1>
    %109 = arith.extui %108 : vector<8x16xi1> to vector<8x16xi32>
    %110 = arith.sitofp %109 : vector<8x16xi32> to vector<8x16xf32>
    %111 = arith.addf %99, %110 : vector<8x16xf32>
    %112 = vector.extract_strided_slice %11 {offsets = [0, 8], sizes = [8, 1], strides = [1, 1]} : vector<8x16xf32> to vector<8x1xf32>
    %113 = vector.broadcast %112 : vector<8x1xf32> to vector<8x16xf32>
    %114 = arith.cmpf ogt, %113, %11 : vector<8x16xf32>
    %115 = vector.broadcast %112 : vector<8x1xf32> to vector<8x16xf32>
    %116 = arith.cmpf oeq, %115, %11 : vector<8x16xf32>
    %c8_i32 = arith.constant 8 : i32
    %117 = vector.broadcast %c8_i32 : i32 to vector<8x16xi32>
    %118 = arith.cmpi sgt, %14, %117 : vector<8x16xi32>
    %119 = arith.andi %116, %118 : vector<8x16xi1>
    %120 = arith.ori %114, %119 : vector<8x16xi1>
    %121 = arith.extui %120 : vector<8x16xi1> to vector<8x16xi32>
    %122 = arith.sitofp %121 : vector<8x16xi32> to vector<8x16xf32>
    %123 = arith.addf %111, %122 : vector<8x16xf32>
    %124 = vector.extract_strided_slice %11 {offsets = [0, 9], sizes = [8, 1], strides = [1, 1]} : vector<8x16xf32> to vector<8x1xf32>
    %125 = vector.broadcast %124 : vector<8x1xf32> to vector<8x16xf32>
    %126 = arith.cmpf ogt, %125, %11 : vector<8x16xf32>
    %127 = vector.broadcast %124 : vector<8x1xf32> to vector<8x16xf32>
    %128 = arith.cmpf oeq, %127, %11 : vector<8x16xf32>
    %c9_i32 = arith.constant 9 : i32
    %129 = vector.broadcast %c9_i32 : i32 to vector<8x16xi32>
    %130 = arith.cmpi sgt, %14, %129 : vector<8x16xi32>
    %131 = arith.andi %128, %130 : vector<8x16xi1>
    %132 = arith.ori %126, %131 : vector<8x16xi1>
    %133 = arith.extui %132 : vector<8x16xi1> to vector<8x16xi32>
    %134 = arith.sitofp %133 : vector<8x16xi32> to vector<8x16xf32>
    %135 = arith.addf %123, %134 : vector<8x16xf32>
    %136 = vector.extract_strided_slice %11 {offsets = [0, 10], sizes = [8, 1], strides = [1, 1]} : vector<8x16xf32> to vector<8x1xf32>
    %137 = vector.broadcast %136 : vector<8x1xf32> to vector<8x16xf32>
    %138 = arith.cmpf ogt, %137, %11 : vector<8x16xf32>
    %139 = vector.broadcast %136 : vector<8x1xf32> to vector<8x16xf32>
    %140 = arith.cmpf oeq, %139, %11 : vector<8x16xf32>
    %c10_i32 = arith.constant 10 : i32
    %141 = vector.broadcast %c10_i32 : i32 to vector<8x16xi32>
    %142 = arith.cmpi sgt, %14, %141 : vector<8x16xi32>
    %143 = arith.andi %140, %142 : vector<8x16xi1>
    %144 = arith.ori %138, %143 : vector<8x16xi1>
    %145 = arith.extui %144 : vector<8x16xi1> to vector<8x16xi32>
    %146 = arith.sitofp %145 : vector<8x16xi32> to vector<8x16xf32>
    %147 = arith.addf %135, %146 : vector<8x16xf32>
    %148 = vector.extract_strided_slice %11 {offsets = [0, 11], sizes = [8, 1], strides = [1, 1]} : vector<8x16xf32> to vector<8x1xf32>
    %149 = vector.broadcast %148 : vector<8x1xf32> to vector<8x16xf32>
    %150 = arith.cmpf ogt, %149, %11 : vector<8x16xf32>
    %151 = vector.broadcast %148 : vector<8x1xf32> to vector<8x16xf32>
    %152 = arith.cmpf oeq, %151, %11 : vector<8x16xf32>
    %c11_i32 = arith.constant 11 : i32
    %153 = vector.broadcast %c11_i32 : i32 to vector<8x16xi32>
    %154 = arith.cmpi sgt, %14, %153 : vector<8x16xi32>
    %155 = arith.andi %152, %154 : vector<8x16xi1>
    %156 = arith.ori %150, %155 : vector<8x16xi1>
    %157 = arith.extui %156 : vector<8x16xi1> to vector<8x16xi32>
    %158 = arith.sitofp %157 : vector<8x16xi32> to vector<8x16xf32>
    %159 = arith.addf %147, %158 : vector<8x16xf32>
    %160 = vector.extract_strided_slice %11 {offsets = [0, 12], sizes = [8, 1], strides = [1, 1]} : vector<8x16xf32> to vector<8x1xf32>
    %161 = vector.broadcast %160 : vector<8x1xf32> to vector<8x16xf32>
    %162 = arith.cmpf ogt, %161, %11 : vector<8x16xf32>
    %163 = vector.broadcast %160 : vector<8x1xf32> to vector<8x16xf32>
    %164 = arith.cmpf oeq, %163, %11 : vector<8x16xf32>
    %c12_i32 = arith.constant 12 : i32
    %165 = vector.broadcast %c12_i32 : i32 to vector<8x16xi32>
    %166 = arith.cmpi sgt, %14, %165 : vector<8x16xi32>
    %167 = arith.andi %164, %166 : vector<8x16xi1>
    %168 = arith.ori %162, %167 : vector<8x16xi1>
    %169 = arith.extui %168 : vector<8x16xi1> to vector<8x16xi32>
    %170 = arith.sitofp %169 : vector<8x16xi32> to vector<8x16xf32>
    %171 = arith.addf %159, %170 : vector<8x16xf32>
    %172 = vector.extract_strided_slice %11 {offsets = [0, 13], sizes = [8, 1], strides = [1, 1]} : vector<8x16xf32> to vector<8x1xf32>
    %173 = vector.broadcast %172 : vector<8x1xf32> to vector<8x16xf32>
    %174 = arith.cmpf ogt, %173, %11 : vector<8x16xf32>
    %175 = vector.broadcast %172 : vector<8x1xf32> to vector<8x16xf32>
    %176 = arith.cmpf oeq, %175, %11 : vector<8x16xf32>
    %c13_i32 = arith.constant 13 : i32
    %177 = vector.broadcast %c13_i32 : i32 to vector<8x16xi32>
    %178 = arith.cmpi sgt, %14, %177 : vector<8x16xi32>
    %179 = arith.andi %176, %178 : vector<8x16xi1>
    %180 = arith.ori %174, %179 : vector<8x16xi1>
    %181 = arith.extui %180 : vector<8x16xi1> to vector<8x16xi32>
    %182 = arith.sitofp %181 : vector<8x16xi32> to vector<8x16xf32>
    %183 = arith.addf %171, %182 : vector<8x16xf32>
    %184 = vector.extract_strided_slice %11 {offsets = [0, 14], sizes = [8, 1], strides = [1, 1]} : vector<8x16xf32> to vector<8x1xf32>
    %185 = vector.broadcast %184 : vector<8x1xf32> to vector<8x16xf32>
    %186 = arith.cmpf ogt, %185, %11 : vector<8x16xf32>
    %187 = vector.broadcast %184 : vector<8x1xf32> to vector<8x16xf32>
    %188 = arith.cmpf oeq, %187, %11 : vector<8x16xf32>
    %c14_i32 = arith.constant 14 : i32
    %189 = vector.broadcast %c14_i32 : i32 to vector<8x16xi32>
    %190 = arith.cmpi sgt, %14, %189 : vector<8x16xi32>
    %191 = arith.andi %188, %190 : vector<8x16xi1>
    %192 = arith.ori %186, %191 : vector<8x16xi1>
    %193 = arith.extui %192 : vector<8x16xi1> to vector<8x16xi32>
    %194 = arith.sitofp %193 : vector<8x16xi32> to vector<8x16xf32>
    %195 = arith.addf %183, %194 : vector<8x16xf32>
    %196 = vector.extract_strided_slice %11 {offsets = [0, 15], sizes = [8, 1], strides = [1, 1]} : vector<8x16xf32> to vector<8x1xf32>
    %197 = vector.broadcast %196 : vector<8x1xf32> to vector<8x16xf32>
    %198 = arith.cmpf ogt, %197, %11 : vector<8x16xf32>
    %199 = vector.broadcast %196 : vector<8x1xf32> to vector<8x16xf32>
    %200 = arith.cmpf oeq, %199, %11 : vector<8x16xf32>
    %c15_i32 = arith.constant 15 : i32
    %201 = vector.broadcast %c15_i32 : i32 to vector<8x16xi32>
    %202 = arith.cmpi sgt, %14, %201 : vector<8x16xi32>
    %203 = arith.andi %200, %202 : vector<8x16xi1>
    %204 = arith.ori %198, %203 : vector<8x16xi1>
    %205 = arith.extui %204 : vector<8x16xi1> to vector<8x16xi32>
    %206 = arith.sitofp %205 : vector<8x16xi32> to vector<8x16xf32>
    %207 = arith.addf %195, %206 : vector<8x16xf32>
    %cst_8 = arith.constant 8.000000e+00 : f32
    %208 = vector.broadcast %cst_8 : f32 to vector<8x16xf32>
    %209 = arith.cmpf olt, %207, %208 : vector<8x16xf32>
    %cst_9 = arith.constant 0.000000e+00 : f32
    %210 = vector.broadcast %cst_9 : f32 to vector<8x16xf32>
    %211 = arith.select %209, %11, %210 : vector<8x16xi1>, vector<8x16xf32>
    %cst_10 = arith.constant dense<0.000000e+00> : vector<8xf32>
    %212 = vector.multi_reduction <add>, %211, %cst_10 [1] : vector<8x16xf32> to vector<8xf32>
    %213 = vector.shape_cast %212 : vector<8xf32> to vector<8x1xf32>
    %cst_11 = arith.constant 9.99999997E-7 : f32
    %214 = vector.broadcast %cst_11 : f32 to vector<8x1xf32>
    %215 = arith.mulf %214, %13 : vector<8x1xf32>
    %216 = arith.addf %213, %215 : vector<8x1xf32>
    %217 = tpu.reciprocal %216 {approx = true} : vector<8x1xf32> -> vector<8x1xf32>
    %218 = arith.mulf %216, %217 : vector<8x1xf32>
    %cst_12 = arith.constant 2.000000e+00 : f32
    %219 = vector.broadcast %cst_12 : f32 to vector<8x1xf32>
    %220 = arith.subf %219, %218 : vector<8x1xf32>
    %221 = arith.mulf %217, %220 : vector<8x1xf32>
    %222 = vector.broadcast %221 : vector<8x1xf32> to vector<8x16xf32>
    %223 = arith.mulf %211, %222 : vector<8x16xf32>
    %224 = arith.mulf %213, %221 : vector<8x1xf32>
    %c0_13 = arith.constant 0 : index
    %c0_14 = arith.constant 0 : index
    %225 = vector.load %arg4[%c0_13, %c0_14] : memref<8x16xf32, #tpu.memory_space<vmem>>, vector<8x16xf32>
    tpu.vector_store %arg4[%c0_13, %c0_14], %223 {strides = array<i32>} : memref<8x16xf32, #tpu.memory_space<vmem>>, vector<8x16xf32>,
    %226 = vector.extract_strided_slice %5 {offsets = [0, 16], sizes = [8, 32], strides = [1, 1]} : vector<8x128xf32> to vector<8x32xf32>
    %227 = vector.broadcast %224 : vector<8x1xf32> to vector<8x32xf32>
    %228 = arith.mulf %226, %227 : vector<8x32xf32>
    %c0_15 = arith.constant 0 : index
    %c0_16 = arith.constant 0 : index
    %229 = vector.load %arg5[%c0_15, %c0_16] : memref<8x32xf32, #tpu.memory_space<vmem>>, vector<8x32xf32>
    tpu.vector_store %arg5[%c0_15, %c0_16], %228 {strides = array<i32>} : memref<8x32xf32, #tpu.memory_space<vmem>>, vector<8x32xf32>,
    %cst_17 = arith.constant dense<0.000000e+00> : vector<16xf32>
    %230 = vector.multi_reduction <add>, %223, %cst_17 [0] : vector<8x16xf32> to vector<16xf32>
    %231 = vector.shape_cast %230 : vector<16xf32> to vector<1x16xf32>
    %c0_18 = arith.constant 0 : index
    %c0_19 = arith.constant 0 : index
    %c0_20 = arith.constant 0 : index
    %232 = vector.load %arg6[%c0_18, %c0_19, %c0_20] : memref<1x1x16xf32, #tpu.memory_space<vmem>>, vector<1x1x16xf32>
    %233 = vector.shape_cast %232 : vector<1x1x16xf32> to vector<1x16xf32>
    %234 = vector.shape_cast %231 : vector<1x16xf32> to vector<1x1x16xf32>
    tpu.vector_store %arg6[%c0_18, %c0_19, %c0_20], %234 {strides = array<i32>} : memref<1x1x16xf32, #tpu.memory_space<vmem>>, vector<1x1x16xf32>,
    %cst_21 = arith.constant 0.000000e+00 : f32
    %235 = vector.broadcast %cst_21 : f32 to vector<8x16xf32>
    %236 = arith.cmpf ogt, %223, %235 : vector<8x16xf32>
    %237 = arith.extui %236 : vector<8x16xi1> to vector<8x16xi32>
    %238 = arith.sitofp %237 : vector<8x16xi32> to vector<8x16xf32>
    %cst_22 = arith.constant dense<0.000000e+00> : vector<16xf32>
    %239 = vector.multi_reduction <add>, %238, %cst_22 [0] : vector<8x16xf32> to vector<16xf32>
    %240 = vector.shape_cast %239 : vector<16xf32> to vector<1x16xf32>
    %c0_23 = arith.constant 0 : index
    %c0_24 = arith.constant 0 : index
    %c0_25 = arith.constant 0 : index
    %241 = vector.load %arg7[%c0_23, %c0_24, %c0_25] : memref<1x1x16xf32, #tpu.memory_space<vmem>>, vector<1x1x16xf32>
    %242 = vector.shape_cast %241 : vector<1x1x16xf32> to vector<1x16xf32>
    %243 = vector.shape_cast %240 : vector<1x16xf32> to vector<1x1x16xf32>
    tpu.vector_store %arg7[%c0_23, %c0_24, %c0_25], %243 {strides = array<i32>} : memref<1x1x16xf32, #tpu.memory_space<vmem>>, vector<1x1x16xf32>,
    return
  }
  func.func @transform_0(%arg0: i32) -> (i32, i32) {
    %c0_i32 = arith.constant 0 : i32
    %c0_i32_0 = arith.constant 0 : i32
    return %arg0, %c0_i32 : i32, i32
  }
  func.func @transform_1(%arg0: i32) -> (i32, i32) {
    %c0_i32 = arith.constant 0 : i32
    %c0_i32_0 = arith.constant 0 : i32
    %c0_i32_1 = arith.constant 0 : i32
    return %c0_i32, %c0_i32_0 : i32, i32
  }
  func.func @transform_2(%arg0: i32) -> (i32, i32) {
    %c0_i32 = arith.constant 0 : i32
    %c0_i32_0 = arith.constant 0 : i32
    %c0_i32_1 = arith.constant 0 : i32
    return %c0_i32, %c0_i32_0 : i32, i32
  }
  func.func @transform_3(%arg0: i32) -> (i32, i32) {
    %c0_i32 = arith.constant 0 : i32
    %c0_i32_0 = arith.constant 0 : i32
    return %arg0, %c0_i32 : i32, i32
  }
  func.func @transform_4(%arg0: i32) -> (i32, i32) {
    %c0_i32 = arith.constant 0 : i32
    %c0_i32_0 = arith.constant 0 : i32
    return %arg0, %c0_i32 : i32, i32
  }
  func.func @transform_5(%arg0: i32) -> (i32, i32, i32) {
    %c0_i32 = arith.constant 0 : i32
    %c0_i32_0 = arith.constant 0 : i32
    %c0_i32_1 = arith.constant 0 : i32
    return %arg0, %c0_i32, %c0_i32_0 : i32, i32, i32
  }
  func.func @transform_6(%arg0: i32) -> (i32, i32, i32) {
    %c0_i32 = arith.constant 0 : i32
    %c0_i32_0 = arith.constant 0 : i32
    %c0_i32_1 = arith.constant 0 : i32
    return %arg0, %c0_i32, %c0_i32_0 : i32, i32, i32
  }
}

</mosaic_0001>

<bundles_post_ra>
// kernel: gating_forward.1
= control target key start
LH: loop header
LB: loop body
LE: loop exit
PB: predicated region body
PF: predicated region fallthrough
CT: control target
= control target key end

     0   :  { %12 = vsyncpa [#allocation3], 0  ;;  %v519_v3 = vmov 0.0|0.0   ;;  %vm520_vm0 = vmmov 0   ;;  %v521_v6 = vmov 0.0   ;;  %s725_s0 = inlined_call_operand.vmem [shape: f32[8,32], index: 0, kind: input, shape index: {}]   ;;  %s726_s1 = inlined_call_operand.vmem [shape: f32[32,128], index: 1, kind: input, shape index: {}]   ;;  %s727_s2 = inlined_call_operand.vmem [shape: f32[1,128], index: 2, kind: input, shape index: {}]   ;;  %s728_s3 = inlined_call_operand.hbm [shape: f32[8,16], index: 3, kind: output, shape index: {0}]   ;;  %s729_s4 = inlined_call_operand.hbm [shape: f32[8,32], index: 4, kind: output, shape index: {1}]   ;;  %s730_s5 = inlined_call_operand.vmem [shape: f32[1,1,16], index: 5, kind: output, shape index: {2}]   ;;  %s731_s6 = inlined_call_operand.vmem [shape: f32[1,1,16], index: 6, kind: output, shape index: {3}]  }
   0x1   :  { %v21_v0 = vld [vmem:[%s726_s1] sm:$0xff]  ;;  %v22_v1 = vld [vmem:[%s726_s1 + $0x8] sm:$0xff]  ;;  %v23_v2 = vld [vmem:[%s726_s1 + $0x10] sm:$0xff]  ;;  %422 = vmatprep.subr.bf16.mxu0 %v519_v3  ;;  %419 = vmatprep.mubr.msk.f32.mxu0 %vm520_vm0, %v521_v6 }
   0x2   :  { %v423_v4 = vpack.c.bf16 %v22_v1, %v21_v0  ;;  %v24_v5 = vld [vmem:[%s726_s1 + $0x18] sm:$0xff] }
   0x3   :  { %13 = vsyncpa [#allocation5], 0  ;;  %v426_v7 = vpack.c.bf16 %v24_v5, %v23_v2  ;;  %v20_v8 = vld [vmem:[%s725_s0] sm:$0xff]  ;;  %vm732_vm1 = vcmask 261120   ;;  %vm733_vm2 = vcmask 130048   ;;  %v522_v14 = vmov 1  }
   0x4   :  { %424 = vmatpush3.bf16.msra.mxu0 %v423_v4  ;;  %v387_v9 = vld [vmem:[%s727_s2] ss:$0 sm:$0xff]  ;;  %451 = vset.pattern.permute.xlu1 %v522_v14  ;;  %v523_v15 = vmov 0   ;;  %v524_v20 = vmov 2   ;;  %v525_v21 = vmov 13   ;;  %v526_v22 = vmov 3  }
   0x5   :  { %425 = vmatprep.subr.bf16.mxu0 %v519_v3  ;;  %450 = vset.pattern.permute.xlu0 %v523_v15  ;;  %v527_v23 = vmov 15   ;;  %v528_v24 = vmov 4   ;;  %v529_v25 = vmov 5   ;;  %v530_v26 = vmov 6   ;;  %s538_s0 = smov [#allocation2]  }
   0x6   :  { %v531_v27 = vmov 7   ;;  %v532_v28 = vmov 8   ;;  %v533_v30 = vmov 9   ;;  %v534_v31 = vmov 10   ;;  %s357_s1 = sshll.u32 %s538_s0, 4  ;;  %s358_s1 = int_to_ptr.vmem [resolvable:$true] %s357_s1 }
   0x7   :  { %v535_v32 = vmov 11   ;;  %v536_v33 = vmov 12   ;;  %v537_v34 = vmov 14   ;;  %v116_v39 = vlaneseq  ;;  %s471_s2 = scalar_lea.vmem %s358_s1, 128  ;;  %p476_p1 = scmp.lt.s32.totalorder %s358_s1, %s358_s1 }
   0x8   :  { %427 = vmatpush3.bf16.msra.mxu0 %v426_v7  ;;  %p472_p0 = scmp.ne.s32.totalorder %s358_s1, %s471_s2  ;;  %p477_p2 = scmp.lt.s32.totalorder %s471_s2, %s471_s2 }
   0x9   :  { %v621_v40 = vand.u32 127, %v116_v39 }
   0xa   :  { %p478_p3 = por %p477_p2, %p476_p1 }
   0xb   :  { %420 = vmatmul.mubr.msk.f32.vlgmr.msra.gmra.mrb[0].mxu0 %vm732_vm1, %v20_v8  ;;  %vm137_vm3 = vcmp.gt.s32.totalorder %v621_v40, 1  ;;  %vm125_vm5 = vcmp.gt.s32.totalorder %v621_v40, 0  ;;  %vm149_vm9 = vcmp.gt.s32.totalorder %v621_v40, 2  ;;  %vm161_vm14 = vcmp.gt.s32.totalorder %v621_v40, 3 }
   0xc   :  { %p479_p4 = pnand %p478_p3, %p472_p0 }
  0xde   :  { %v102_v10 = vpop.f32.mrb[0].mxu0 }
  0xdf   :  { %v596_v11 = vadd.f32 %v387_v9, %v102_v10  ;;  %v421_v12 = vpop.f32.mrb[1].mxu0 }
  0xe1   :  { %v107_v13 = vsel %vm733_vm2, %v596_v11, -inf }
  0xe2   :  { %108 = vmax.xlane.f32.xlu0 %v107_v13 }
 0x16f   :  { %v109_v16 = vpop.xlane.xlu0 %108 }
 0x170   :  { %v110_v17 = vsub.f32 %v596_v11, %v109_v16 }
 0x172   :  { %v111_v18 = vmul.f32 1.442695, %v110_v17 }
 0x174   :  { %467 = vpow2.f32 %v111_v18 }
 0x17e   :  { %v601_v19 = vpop.eup %467 }
 0x17f   :  { %132 = vperm.xlu1 %451, %v601_v19   ;;  %120 = vperm.xlu0 %450, %v601_v19   ;;  %v113_v29 = vsel %vm733_vm2, %v601_v19, 0.0 }
 0x183   :  { %452 = vset.pattern.permute.xlu1 %v524_v20  ;;  %463 = vset.pattern.permute.xlu0 %v525_v21 }
 0x184   :  { %144 = vperm.xlu1 %452, %v601_v19   ;;  %276 = vperm.xlu0 %463, %v601_v19  }
 0x188   :  { %453 = vset.pattern.permute.xlu1 %v526_v22  ;;  %466 = vset.pattern.permute.xlu0 %v527_v23 }
 0x189   :  { %156 = vperm.xlu1 %453, %v601_v19  }
 0x18d   :  { %454 = vset.pattern.permute.xlu1 %v528_v24 }
 0x18e   :  { %168 = vperm.xlu1 %454, %v601_v19  }
 0x192   :  { %455 = vset.pattern.permute.xlu1 %v529_v25 }
 0x193   :  { %180 = vperm.xlu1 %455, %v601_v19  }
 0x197   :  { %456 = vset.pattern.permute.xlu1 %v530_v26 }
 0x198   :  { %192 = vperm.xlu1 %456, %v601_v19  }
 0x19c   :  { %457 = vset.pattern.permute.xlu1 %v531_v27 }
 0x19d   :  { %204 = vperm.xlu1 %457, %v601_v19  }
 0x1a1   :  { %458 = vset.pattern.permute.xlu1 %v532_v28 }
 0x1a2   :  { %216 = vperm.xlu1 %458, %v601_v19  }
 0x1a3   :  { %114 = vadd.xlane.f32.xlu0 %v113_v29 }
 0x1a6   :  { %459 = vset.pattern.permute.xlu1 %v533_v30 }
 0x1a7   :  { %228 = vperm.xlu1 %459, %v601_v19  }
 0x1ab   :  { %460 = vset.pattern.permute.xlu1 %v534_v31 }
 0x1ac   :  { %240 = vperm.xlu1 %460, %v601_v19  }
 0x1b0   :  { %461 = vset.pattern.permute.xlu1 %v535_v32 }
 0x1b1   :  { %252 = vperm.xlu1 %461, %v601_v19  }
 0x1b5   :  { %462 = vset.pattern.permute.xlu1 %v536_v33 }
 0x1b6   :  { %264 = vperm.xlu1 %462, %v601_v19  }
 0x1ba   :  { %464 = vset.pattern.permute.xlu1 %v537_v34 }
 0x1bb   :  { %288 = vperm.xlu1 %464, %v601_v19  }
 0x1bf   :  { %465 = vset.pattern.permute.xlu1 %v527_v23 }
 0x1c0   :  { %300 = vperm.xlu1 %465, %v601_v19  }
 0x1fe   :  { %v133_v35 = vpop.permute.xlu1 %132  ;;  %v121_v42 = vpop.permute.xlu0 %120 }
 0x1ff   :  { %vm136_vm4 = vcmp.eq.f32.partialorder %v133_v35, %v601_v19  ;;  %vm124_vm6 = vcmp.eq.f32.partialorder %v121_v42, %v601_v19  ;;  %vm135_vm7 = vcmp.gt.f32.partialorder %v133_v35, %v601_v19  ;;  %vm123_vm11 = vcmp.gt.f32.partialorder %v121_v42, %v601_v19 }
 0x200   :  { %vm138_vm8 = vmand %vm136_vm4, %vm137_vm3  ;;  %vm173_vm3 = vcmp.gt.s32.totalorder %v621_v40, 4 }
 0x201   :  { %vm126_vm12 = vmand %vm124_vm6, %vm125_vm5 }
 0x202   :  { %vm139_vm13 = vmor %vm135_vm7, %vm138_vm8  ;;  %vm185_vm8 = vcmp.gt.s32.totalorder %v621_v40, 5 }
 0x203   :  { %v145_v36 = vpop.permute.xlu1 %144  ;;  %vm127_vm2 = vmor %vm123_vm11, %vm126_vm12  ;;  %v390_v45 = vsel %vm139_vm13, 1.0, %v521_v6  ;;  %v277_v63 = vpop.permute.xlu0 %276 }
 0x204   :  { %vm148_vm10 = vcmp.eq.f32.partialorder %v145_v36, %v601_v19  ;;  %vm147_vm0 = vcmp.gt.f32.partialorder %v145_v36, %v601_v19  ;;  %v389_v46 = vsel %vm127_vm2, 1.0, %v521_v6  ;;  %vm209_vm2 = vcmp.gt.s32.totalorder %v621_v40, 7 }
 0x205   :  { %vm150_vm1 = vmand %vm148_vm10, %vm149_vm9  ;;  %v142_v49 = vadd.f32 %v390_v45, %v389_v46 }
 0x206   :  { %vm151_vm7 = vmor %vm147_vm0, %vm150_vm1 }
 0x207   :  { %v391_v48 = vsel %vm151_vm7, 1.0, %v521_v6  ;;  %vm221_vm7 = vcmp.gt.s32.totalorder %v621_v40, 8 }
 0x208   :  { %v157_v37 = vpop.permute.xlu1 %156  ;;  %v154_v51 = vadd.f32 %v391_v48, %v142_v49 }
 0x209   :  { %vm160_vm15 = vcmp.eq.f32.partialorder %v157_v37, %v601_v19  ;;  %vm159_vm5 = vcmp.gt.f32.partialorder %v157_v37, %v601_v19 }
 0x20a   :  { %vm162_vm6 = vmand %vm160_vm15, %vm161_vm14  ;;  %vm197_vm14 = vcmp.gt.s32.totalorder %v621_v40, 6 }
 0x20b   :  { %vm163_vm12 = vmor %vm159_vm5, %vm162_vm6 }
 0x20c   :  { %v392_v50 = vsel %vm163_vm12, 1.0, %v521_v6  ;;  %vm233_vm12 = vcmp.gt.s32.totalorder %v621_v40, 9 }
 0x20d   :  { %v169_v38 = vpop.permute.xlu1 %168  ;;  %v166_v54 = vadd.f32 %v392_v50, %v154_v51 }
 0x20e   :  { %vm172_vm4 = vcmp.eq.f32.partialorder %v169_v38, %v601_v19  ;;  %vm171_vm10 = vcmp.gt.f32.partialorder %v169_v38, %v601_v19 }
 0x20f   :  { %vm174_vm11 = vmand %vm172_vm4, %vm173_vm3 }
 0x210   :  { %vm175_vm13 = vmor %vm171_vm10, %vm174_vm11 }
 0x211   :  { %v393_v53 = vsel %vm175_vm13, 1.0, %v521_v6  ;;  %vm245_vm13 = vcmp.gt.s32.totalorder %v621_v40, 10 }
 0x212   :  { %v181_v41 = vpop.permute.xlu1 %180  ;;  %v178_v56 = vadd.f32 %v393_v53, %v166_v54 }
 0x213   :  { %vm184_vm9 = vcmp.eq.f32.partialorder %v181_v41, %v601_v19  ;;  %vm183_vm1 = vcmp.gt.f32.partialorder %v181_v41, %v601_v19 }
 0x214   :  { %vm186_vm0 = vmand %vm184_vm9, %vm185_vm8 }
 0x215   :  { %vm187_vm6 = vmor %vm183_vm1, %vm186_vm0 }
 0x216   :  { %v394_v55 = vsel %vm187_vm6, 1.0, %v521_v6 }
 0x217   :  { %v193_v43 = vpop.permute.xlu1 %192  ;;  %v190_v59 = vadd.f32 %v394_v55, %v178_v56 }
 0x218   :  { %vm196_vm15 = vcmp.eq.f32.partialorder %v193_v43, %v601_v19  ;;  %vm195_vm4 = vcmp.gt.f32.partialorder %v193_v43, %v601_v19 }
 0x219   :  { %vm198_vm5 = vmand %vm196_vm15, %vm197_vm14 }
 0x21a   :  { %vm199_vm11 = vmor %vm195_vm4, %vm198_vm5 }
 0x21b   :  { %v395_v57 = vsel %vm199_vm11, 1.0, %v521_v6 }
 0x21c   :  { %v205_v44 = vpop.permute.xlu1 %204  ;;  %v202_v61 = vadd.f32 %v395_v57, %v190_v59 }
 0x21d   :  { %vm208_vm3 = vcmp.eq.f32.partialorder %v205_v44, %v601_v19  ;;  %vm207_vm9 = vcmp.gt.f32.partialorder %v205_v44, %v601_v19 }
 0x21e   :  { %vm210_vm10 = vmand %vm208_vm3, %vm209_vm2 }
 0x21f   :  { %vm211_vm0 = vmor %vm207_vm9, %vm210_vm10  ;;  %vm257_vm9 = vcmp.gt.s32.totalorder %v621_v40, 11 }
 0x220   :  { %v396_v60 = vsel %vm211_vm0, 1.0, %v521_v6 }
 0x221   :  { %v217_v47 = vpop.permute.xlu1 %216  ;;  %v214_v0 = vadd.f32 %v396_v60, %v202_v61 }
 0x222   :  { %vm220_vm8 = vcmp.eq.f32.partialorder %v217_v47, %v601_v19  ;;  %vm219_vm15 = vcmp.gt.f32.partialorder %v217_v47, %v601_v19 }
 0x223   :  { %vm222_vm1 = vmand %vm220_vm8, %vm221_vm7 }
 0x224   :  { %vm223_vm4 = vmor %vm219_vm15, %vm222_vm1  ;;  %vm281_vm15 = vcmp.gt.s32.totalorder %v621_v40, 13  ;;  %vm280_vm1 = vcmp.eq.f32.partialorder %v277_v63, %v601_v19 }
 0x225   :  { %v397_v62 = vsel %vm223_vm4, 1.0, %v521_v6 }
 0x226   :  { %v229_v52 = vpop.permute.xlu1 %228  ;;  %v226_v3 = vadd.f32 %v397_v62, %v214_v0 }
 0x227   :  { %vm232_vm14 = vcmp.eq.f32.partialorder %v229_v52, %v601_v19  ;;  %vm231_vm2 = vcmp.gt.f32.partialorder %v229_v52, %v601_v19 }
 0x228   :  { %vm234_vm3 = vmand %vm232_vm14, %vm233_vm12 }
 0x229   :  { %vm235_vm8 = vmor %vm231_vm2, %vm234_vm3 }
 0x22a   :  { %v398_v2 = vsel %vm235_vm8, 1.0, %v521_v6  ;;  %vm282_vm2 = vmand %vm280_vm1, %vm281_vm15  ;;  %vm293_vm8 = vcmp.gt.s32.totalorder %v621_v40, 14  ;;  %vm305_vm15 = vcmp.gt.s32.totalorder %v621_v40, 15 }
 0x22b   :  { %v241_v58 = vpop.permute.xlu1 %240  ;;  %v238_v5 = vadd.f32 %v398_v2, %v226_v3 }
 0x22c   :  { %vm244_vm5 = vcmp.eq.f32.partialorder %v241_v58, %v601_v19  ;;  %vm243_vm6 = vcmp.gt.f32.partialorder %v241_v58, %v601_v19 }
 0x22d   :  { %vm246_vm7 = vmand %vm244_vm5, %vm245_vm13  ;;  %vm269_vm13 = vcmp.gt.s32.totalorder %v621_v40, 12  ;;  %vm279_vm5 = vcmp.gt.f32.partialorder %v277_v63, %v601_v19 }
 0x22e   :  { %vm247_vm10 = vmor %vm243_vm6, %vm246_vm7 }
 0x22f   :  { %v399_v4 = vsel %vm247_vm10, 1.0, %v521_v6 }
 0x230   :  { %v253_v1 = vpop.permute.xlu1 %252  ;;  %v250_v9 = vadd.f32 %v399_v4, %v238_v5  ;;  %v115_v25 = vpop.xlane.xlu0 %114 }
 0x231   :  { %vm255_vm11 = vcmp.gt.f32.partialorder %v253_v1, %v601_v19  ;;  %vm256_vm12 = vcmp.eq.f32.partialorder %v253_v1, %v601_v19  ;;  %v316_v26 = vmul.f32 1e-06, %v115_v25 }
 0x232   :  { %vm258_vm14 = vmand %vm256_vm12, %vm257_vm9 }
 0x233   :  { %vm259_vm0 = vmor %vm255_vm11, %vm258_vm14 }
 0x234   :  { %v400_v7 = vsel %vm259_vm0, 1.0, %v521_v6  ;;  %vm283_vm9 = vmor %vm279_vm5, %vm282_vm2 }
 0x235   :  { %v265_v8 = vpop.permute.xlu1 %264  ;;  %v262_v10 = vadd.f32 %v400_v7, %v250_v9  ;;  %v402_v15 = vsel %vm283_vm9, 1.0, %v521_v6 }
 0x236   :  { %vm267_vm3 = vcmp.gt.f32.partialorder %v265_v8, %v601_v19  ;;  %vm268_vm4 = vcmp.eq.f32.partialorder %v265_v8, %v601_v19 }
 0x237   :  { %vm270_vm6 = vmand %vm268_vm4, %vm269_vm13  ;;  %vm734_vm4 = vcmask 130048  }
 0x238   :  { %vm271_vm7 = vmor %vm267_vm3, %vm270_vm6 }
 0x239   :  { %v401_v12 = vsel %vm271_vm7, 1.0, %v521_v6  ;;  %vm735_vm5 = vmmov %vm734_vm4 }
 0x23a   :  { %v274_v13 = vadd.f32 %v401_v12, %v262_v10  ;;  %v289_v14 = vpop.permute.xlu1 %288  ;;  %vm736_vm7 = vmmov %vm734_vm4 }
 0x23b   :  { %vm291_vm10 = vcmp.gt.f32.partialorder %v289_v14, %v601_v19  ;;  %vm292_vm11 = vcmp.eq.f32.partialorder %v289_v14, %v601_v19 }
 0x23c   :  { %vm294_vm12 = vmand %vm292_vm11, %vm293_vm8  ;;  %v286_v16 = vadd.f32 %v402_v15, %v274_v13 }
 0x23d   :  { %vm295_vm14 = vmor %vm291_vm10, %vm294_vm12 }
 0x23e   :  { %v403_v17 = vsel %vm295_vm14, 1.0, %v521_v6 }
 0x23f   :  { %v301_v18 = vpop.permute.xlu1 %300  ;;  %v298_v20 = vadd.f32 %v403_v17, %v286_v16 }
 0x240   :  { %vm303_vm1 = vcmp.gt.f32.partialorder %v301_v18, %v601_v19  ;;  %vm304_vm0 = vcmp.eq.f32.partialorder %v301_v18, %v601_v19 }
 0x241   :  { %vm306_vm13 = vmand %vm304_vm0, %vm305_vm15 }
 0x242   :  { %vm307_vm2 = vmor %vm303_vm1, %vm306_vm13 }
 0x243   :  { %v404_v21 = vsel %vm307_vm2, 1.0, %v521_v6 }
 0x244   :  { %v310_v22 = vadd.f32 %v404_v21, %v298_v20 }
 0x246   :  { %vm311_vm3 = vcmp.lt.f32.partialorder %v310_v22, 8.0 }
 0x247   :  { %v312_v23 = vsel %vm311_vm3, %v601_v19, 0.0 }
 0x248   :  { %v313_v24 = vsel %vm734_vm4, %v312_v23, 0.0 }
 0x249   :  { %314 = vadd.xlane.f32.xlu1 %v313_v24 }
 0x2d6   :  { %v315_v27 = vpop.xlane.xlu1 %314 }
 0x2d7   :  { %v317_v28 = vadd.f32 %v316_v26, %v315_v27 }
 0x2d9   :  { %469 = vrcp.f32 %v317_v28 }
 0x2e3   :  { %v470_v29 = vpop.eup %469 }
 0x2e4   :  { %v319_v30 = vmul.f32 %v470_v29, %v317_v28 }
 0x2e6   :  { %v320_v31 = vsub.f32 2.0, %v319_v30 }
 0x2e8   :  { %v321_v32 = vmul.f32 %v470_v29, %v320_v31 }
 0x2ea   :  { %v322_v33 = vmul.f32 %v321_v32, %v312_v23  ;;  %v323_v34 = vmul.f32 %v321_v32, %v315_v27 }
 0x2ec   :  { %v325_v35 = vmul.f32 %v323_v34, %v596_v11  ;;  %v331_v19 = vsel %vm735_vm5, %v322_v33, 0.0  ;;  %vm340_vm6 = vcmp.gt.f32.partialorder %v322_v33, 0.0  ;;  %324 = vst.msk [vmem:[#allocation2] sm:$0xff] %vm736_vm7, %v322_v33 }
 0x2ed   :  { %v332_v36 = vrot.slane %v331_v19, 4  ;;  %v405_v37 = vsel %vm340_vm6, 1.0, %v521_v6 }
 0x2ee   :  { %482 = shalt.err (!%p479_p4)
}
 0x2ef   :  { %s483_s11 = scalar_lea.hbm %s728_s3, 128 }
 0x2f0   :  { %p484_p5 = scmp.ne.s32.totalorder %s728_s3, %s483_s11  ;;  %p487_p6 = scmp.lt.u32.totalorder %s483_s11, %s728_s3 }
 0x2f2   :  { %p489_p7 = pnand %p487_p6, %p484_p5 }
 0x2f4   :  { %492 = shalt.err (!%p489_p7)
}
 0x2f5   :  { %360 = dma.vmem_to_hbm [thread:$0]  %s358_s1, 128, %s728_s3, [#allocation3]   ;;  %vm737_vm8 = vmmov %vm734_vm4  ;;  %v333_v11 = vadd.f32 %v332_v36, %v331_v19  ;;  %vm338_vm9 = vcmask 122880   ;;  %vm738_vm10 = vcmask 261120  }
 0x2f6   :  { %v343_v6 = vsel %vm737_vm8, %v405_v37, 0.0  ;;  %s539_s18 = smov 112   ;;  %s540_s22 = smov [#allocation4]  }
 0x2f7   :  { %327 = vrot.lane.b32.xlu0 %v325_v35, %s539_s18  ;;  %v344_v38 = vrot.slane %v343_v6, 4  ;;  %v334_v39 = vrot.slane %v333_v11, 2  ;;  %s367_s23 = sshll.u32 %s540_s22, 4  ;;  %s368_s23 = int_to_ptr.vmem [resolvable:$true] %s367_s23 }
 0x2f8   :  { %s493_s24 = scalar_lea.vmem %s368_s23, 128  ;;  %p498_p9 = scmp.lt.s32.totalorder %s368_s23, %s368_s23 }
 0x2f9   :  { %v345_v40 = vadd.f32 %v344_v38, %v343_v6  ;;  %v335_v41 = vadd.f32 %v334_v39, %v333_v11  ;;  %p494_p8 = scmp.ne.s32.totalorder %s368_s23, %s493_s24  ;;  %p499_p10 = scmp.lt.s32.totalorder %s493_s24, %s493_s24 }
 0x2fb   :  { %v346_v42 = vrot.slane %v345_v40, 2  ;;  %v336_v43 = vrot.slane %v335_v41, 1  ;;  %p500_p11 = por %p499_p10, %p498_p9 }
 0x2fd   :  { %v347_v44 = vadd.f32 %v346_v42, %v345_v40  ;;  %v337_v45 = vadd.f32 %v336_v43, %v335_v41  ;;  %p501_p12 = pnand %p500_p11, %p494_p8 }
 0x2ff   :  { %v348_v46 = vrot.slane %v347_v44, 1  ;;  %339 = vst.msk [vmem:[%s730_s5] sm:$0x1] %vm338_vm9, %v337_v45 }
 0x301   :  { %v349_v47 = vadd.f32 %v348_v46, %v347_v44 }
 0x303   :  { %350 = vst.msk [vmem:[%s731_s6] sm:$0x1] %vm338_vm9, %v349_v47 }
 0x369   :  { %v328_v48 = vpop.permute.xlu0 %327 }
 0x36a   :  { %330 = vst.msk [vmem:[#allocation4] sm:$0xff] %vm738_vm10, %v328_v48 }
 0x36b   :  { %504 = shalt.err (!%p501_p12)
}
 0x36c   :  { %s505_s26 = scalar_lea.hbm %s729_s4, 128 }
 0x36d   :  { %p506_p13 = scmp.ne.s32.totalorder %s729_s4, %s505_s26  ;;  %p509_p0 = scmp.lt.u32.totalorder %s505_s26, %s729_s4 }
 0x36f   :  { %p511_p1 = pnand %p509_p0, %p506_p13 }
 0x371   :  { %514 = shalt.err (!%p511_p1)
}
 0x372   :  { %370 = dma.vmem_to_hbm [thread:$0]  %s368_s23, 128, %s729_s4, [#allocation5]  }
 0x373   :  { %515 = dma.done.wait [#allocation3], 128  }
 0x374   :  { %516 = vsyncadd [#allocation3], 4294967168 }
 0x375   :  { %517 = dma.done.wait [#allocation5], 128  }
 0x376   :  { %518 = vsyncadd [#allocation5], 4294967168 }
 0x377   :  { %385 = vsyncpa [#allocation3], 1 }
 0x378   :  { %386 = vsyncpa [#allocation5], 1 }

</bundles_post_ra>
